<compile_context>
chip_gen: v5e
topology: v5e:2x2
jax: 0.10.0
libtpu: 0.0.40
codegen_flags: <defaults>
</compile_context>

<pallas_src>
import jax
import jax.numpy as jnp
from jax.experimental import pallas as pl
from jax.experimental.pallas import tpu as pltpu


def _variational_dropout_kernel(mask_ref, x_ref, o_ref):
    """Apply the pre-scaled (1, Hf) keep-mask to one (t_tile, Hf) tile."""
    # mask_ref: (1, Hf), already in x's dtype and scaled by 1/keep_prob; it is
    # resident in VMEM across the whole T grid axis for a given batch row.
    # Native-dtype broadcast multiply along the sublane axis.
    o_ref[...] = x_ref[...] * mask_ref[...]


def _choose_t_tile(Tf, Hf, itemsize, target_bytes=6 * 1024 * 1024):
    """Pick t_tile so a (t_tile, Hf) block is ~target_bytes.

    Dtype-aware sublane alignment (8 rows for f32, 16 for bf16, 32 for int8)
    keeps packed dtypes on full (16,128)/(32,128) vreg tiles. The tile does NOT
    need to divide Tf: the grid uses cdiv and Pallas handles the ragged tail.
    """
    sub = max(8, 32 // max(itemsize, 1))
    if Tf * Hf * itemsize <= target_bytes:
        return Tf  # whole axis fits: block dim == array dim is always legal
    t = (target_bytes // (Hf * itemsize)) // sub * sub
    t = max(t, sub)
    return min(t, Tf)


def variational_dropout(x: jax.Array, key: jax.Array,
                        dropout_value: float = 0.5,
                        training: bool = True) -> jax.Array:
    """Pallas implementation of VariationalDropout.forward.

    x:   (B, T, H) activations (H == module `size`).
    key: jax.random key playing the role of torch's RNG state.
    """
    assert x.ndim == 3, "expected (batch, seq, hidden) input"
    assert 0.0 <= dropout_value < 1.0, "dropout_value must be in [0, 1)"
    if not training or dropout_value == 0.0:
        # Identity when nothing is dropped / eval mode; skip the kernel.
        return x

    B, T, H = x.shape
    keep_prob = 1.0 - dropout_value
    itemsize = x.dtype.itemsize

    # One Bernoulli(keep_prob) mask per (batch, hidden), scaled by 1/keep_prob
    # (inverted dropout), shared across the whole time axis — the
    # "variational / locked" part. Computed once, outside the per-tile path.
    mask = (
        jax.random.bernoulli(key, keep_prob, (B, H)).astype(jnp.float32)
        * (1.0 / keep_prob)
    ).astype(x.dtype)

    # Lane-dense layout: fold k consecutive timesteps into the lane axis when
    # H is not a multiple of 128, so vector stores are unmasked full-width.
    k = 1
    if H % 128 != 0:
        for cand in range(2, T + 1):
            if (cand * H) % 128 == 0 and T % cand == 0:
                k = cand
                break
    Hf, Tf = H * k, T // k
    x_folded = x.reshape(B, Tf, Hf) if k > 1 else x
    mask_folded = jnp.tile(mask, (1, k)) if k > 1 else mask
    mask_folded = mask_folded.reshape(B, 1, Hf)   # native sublane broadcast

    t_tile = _choose_t_tile(Tf, Hf, itemsize)
    num_t = pl.cdiv(Tf, t_tile)
    grid = (B, num_t)

    # VMEM budget: 2x input block + 2x output block (double-buffered) + mask,
    # plus slack. Raise the scoped limit past the v5e/v6e defaults but stay
    # comfortably under v7x's 64 MiB physical VMEM.
    block_bytes = t_tile * Hf * itemsize
    mask_bytes = Hf * itemsize
    vmem_needed = 4 * block_bytes + 2 * mask_bytes + (2 << 20)
    vmem_limit = int(min(max(vmem_needed, 32 << 20), 48 << 20))

    cost = pl.CostEstimate(
        flops=B * Tf * Hf,
        transcendentals=0,
        bytes_accessed=2 * B * Tf * Hf * itemsize + B * Hf * itemsize,
    )

    out = pl.pallas_call(
        _variational_dropout_kernel,
        out_shape=jax.ShapeDtypeStruct((B, Tf, Hf), x.dtype),
        grid_spec=pltpu.PrefetchScalarGridSpec(
            num_scalar_prefetch=0,
            grid=grid,
            in_specs=[
                # Mask: one (1, Hf) row per batch, constant across the T axis
                # -> fetched once per batch row and kept resident in VMEM.
                pl.BlockSpec((None, 1, Hf), lambda b, t: (b, 0, 0)),
                # Activations: contiguous (t_tile, Hf) slab per grid step.
                pl.BlockSpec((None, t_tile, Hf), lambda b, t: (b, t, 0)),
            ],
            out_specs=pl.BlockSpec((None, t_tile, Hf), lambda b, t: (b, t, 0)),
        ),
        compiler_params=pltpu.CompilerParams(
            # (batch, time) tiles are independent -> shard across TensorCores.
            dimension_semantics=("parallel", "parallel"),
            vmem_limit_bytes=vmem_limit,
        ),
        cost_estimate=cost,
    )(mask_folded, x_folded)

    return out.reshape(B, T, H) if k > 1 else out


if __name__ == "__main__":
    # Small shapes consistent with an LSTM LM: batch=2, seq=8, hidden(size)=32.
    dropout_value = 0.5
    keep_prob = 1.0 - dropout_value

    root = jax.random.PRNGKey(0)
    x_key, mask_key, x2_key, mask2_key = jax.random.split(root, 4)

    # --- case 1: H not a multiple of 128 (exercises the lane-folding path) ---
    B, T, H = 2, 8, 32
    x = jax.random.normal(x_key, (B, T, H), dtype=jnp.float32)
    out = jax.block_until_ready(
        variational_dropout(x, mask_key, dropout_value=dropout_value))
    assert out.shape == (B, T, H)

    # Exact reference: recompute the identical wrapper-side mask and compare.
    ref_mask = (jax.random.bernoulli(mask_key, keep_prob, (B, H))
                .astype(jnp.float32) / keep_prob)
    expected = x * ref_mask[:, None, :].astype(x.dtype)
    assert jnp.allclose(out, expected), "kernel output mismatch (folded path)"

    # --- case 2: H a multiple of 128 (no folding) ----------------------------
    B2, T2, H2 = 2, 8, 256
    x2 = jax.random.normal(x2_key, (B2, T2, H2), dtype=jnp.float32)
    out2 = jax.block_until_ready(
        variational_dropout(x2, mask2_key, dropout_value=dropout_value))
    ref_mask2 = (jax.random.bernoulli(mask2_key, keep_prob, (B2, H2))
                 .astype(jnp.float32) / keep_prob)
    expected2 = x2 * ref_mask2[:, None, :].astype(x2.dtype)
    assert jnp.allclose(out2, expected2), "kernel output mismatch (unfolded path)"

    # Eval-mode / p=0 path is a no-op (matches using the module only in train).
    out_eval = variational_dropout(x, mask_key, dropout_value, training=False)
    assert bool(jnp.all(out_eval == x))
    out_p0 = variational_dropout(x, mask_key, 0.0)
    assert bool(jnp.all(out_p0 == x))

    print("KERNEL_OK")
</pallas_src>

<mosaic_0001>
module attributes {stable_mosaic.version = 11 : i64} {
  func.func @_variational_dropout_kernel(%arg0: i32, %arg1: i32, %arg2: memref<1x1x128xf32, #tpu.memory_space<vmem>>, %arg3: memref<1x2x128xf32, #tpu.memory_space<vmem>>, %arg4: memref<1x2x128xf32, #tpu.memory_space<vmem>>) attributes {dimension_semantics = [#tpu.dimension_semantics<parallel>, #tpu.dimension_semantics<parallel>], iteration_bounds = array<i64: 2, 1>, scalar_prefetch = 0 : i64, scratch_operands = 0 : i64, tpu.core_type = #tpu.core_type<tc>, window_params = [{transform_indices = @transform_0, window_bounds = array<i64: 1, 1, 128>}, {transform_indices = @transform_1, window_bounds = array<i64: 1, 2, 128>}, {transform_indices = @transform_2, window_bounds = array<i64: 1, 2, 128>}]} {
    %c0 = arith.constant 0 : index
    %c0_0 = arith.constant 0 : index
    %c0_1 = arith.constant 0 : index
    %0 = vector.load %arg3[%c0, %c0_0, %c0_1] : memref<1x2x128xf32, #tpu.memory_space<vmem>>, vector<1x2x128xf32>
    %1 = vector.shape_cast %0 : vector<1x2x128xf32> to vector<2x128xf32>
    %c0_2 = arith.constant 0 : index
    %c0_3 = arith.constant 0 : index
    %c0_4 = arith.constant 0 : index
    %2 = vector.load %arg2[%c0_2, %c0_3, %c0_4] : memref<1x1x128xf32, #tpu.memory_space<vmem>>, vector<1x1x128xf32>
    %3 = vector.shape_cast %2 : vector<1x1x128xf32> to vector<1x128xf32>
    %4 = vector.broadcast %3 : vector<1x128xf32> to vector<2x128xf32>
    %5 = arith.mulf %1, %4 : vector<2x128xf32>
    %c0_5 = arith.constant 0 : index
    %c0_6 = arith.constant 0 : index
    %c0_7 = arith.constant 0 : index
    %6 = vector.load %arg4[%c0_5, %c0_6, %c0_7] : memref<1x2x128xf32, #tpu.memory_space<vmem>>, vector<1x2x128xf32>
    %7 = vector.shape_cast %6 : vector<1x2x128xf32> to vector<2x128xf32>
    %8 = vector.shape_cast %5 : vector<2x128xf32> to vector<1x2x128xf32>
    tpu.vector_store %arg4[%c0_5, %c0_6, %c0_7], %8 {strides = array<i32>} : memref<1x2x128xf32, #tpu.memory_space<vmem>>, vector<1x2x128xf32>,
    return
  }
  func.func @transform_0(%arg0: i32, %arg1: i32) -> (i32, i32, i32) {
    %c0_i32 = arith.constant 0 : i32
    %c0_i32_0 = arith.constant 0 : i32
    %c0_i32_1 = arith.constant 0 : i32
    return %arg0, %c0_i32, %c0_i32_0 : i32, i32, i32
  }
  func.func @transform_1(%arg0: i32, %arg1: i32) -> (i32, i32, i32) {
    %c0_i32 = arith.constant 0 : i32
    %c0_i32_0 = arith.constant 0 : i32
    return %arg0, %arg1, %c0_i32 : i32, i32, i32
  }
  func.func @transform_2(%arg0: i32, %arg1: i32) -> (i32, i32, i32) {
    %c0_i32 = arith.constant 0 : i32
    %c0_i32_0 = arith.constant 0 : i32
    return %arg0, %arg1, %c0_i32 : i32, i32, i32
  }
}

</mosaic_0001>

<bundles_post_ra>
// kernel: tpu_custom_call.1
= control target key start
LH: loop header
LB: loop body
LE: loop exit
PB: predicated region body
PF: predicated region fallthrough
CT: control target
= control target key end

     0   :  { %7 = vsyncpa [#allocation3], 0  ;;  %s718_s0 = inlined_call_operand.hbm [shape: f32[2,1,128], index: 0, kind: input, shape index: {}]   ;;  %s719_s1 = inlined_call_operand.hbm [shape: f32[2,2,128], index: 1, kind: input, shape index: {}]   ;;  %s720_s2 = inlined_call_operand.hbm [shape: f32[2,2,128], index: 2, kind: output, shape index: {}]  }
   0x1   :  { %9 = vsyncpa [#allocation3 + $0x1], 0 }
   0x2   :  { %10 = vsyncpa [#allocation6], 0 }
   0x3   :  { %12 = vsyncpa [#allocation6 + $0x1], 0 }
   0x4   :  { %13 = vsyncpa [#allocation4], 0 }
   0x5   :  { %15 = vsyncpa [#allocation4 + $0x1], 0  ;;  %s580_s9 = smov 0   ;;  %s582_s10 = smov 0  }
   0x6   :  { %s584_s11 = smov 0   ;;  %s586_s12 = smov 0  }
   0x7   :  { %s588_s13 = smov 0   ;;  %s590_s14 = smov 0  }
   0x8 LB: > { %s336_s15 = sadd.s32 4294967295, %s563_s14   ;;  %s337_s16 = sadd.s32 4294967294, %s563_s14   ;;  %s563_s14 = sphi %s590_s14, %s21_s14   ;;  %s559_s13 = sphi %s588_s13, %s730_s13   ;;  %s555_s12 = sphi %s586_s12, %s729_s12   ;;  %s551_s11 = sphi %s584_s11, %s728_s11   ;;  %s547_s10 = sphi %s582_s10, %s727_s10   ;;  %s543_s9 = sphi %s580_s9, %s726_s9  }
   0x9   : > { %s33_s17 = sadd.s32 1, %s559_s13  ;;  %s40_s18 = sadd.s32 1, %s551_s11 }
   0xa   : > { %p35_p0 = scmp.ge.s32.totalorder %s33_s17, 2  ;;  %p47_p1 = scmp.ne.s32.totalorder %s551_s11, %s547_s10 }
   0xb   : > { %p48_p2 = scmp.eq.s32.totalorder %s563_s14, 0  ;;  %p53_p3 = scmp.ne.s32.totalorder %s547_s10, %s543_s9 }
   0xc   : > { %s732_s17 = smov (%p35_p0, %s33_s17), 0  ;;  %p54_p5 = scmp.eq.s32.totalorder %s336_s15, 0 }
   0xd   : > { %p621_p4 = por %p48_p2, %p47_p1  ;;  %s37_s20 = ssub.s32 %s559_s13, %s732_s17 }
   0xe   : > { %p107_p6 = scmp.eq.s32.totalorder %s336_s15, 1  ;;  %p38_p7 = scmp.eq.s32.totalorder %s37_s20, 0 }
   0xf   : > { %p627_p8 = por %p54_p5, %p53_p3  ;;  %p113_p10 = scmp.eq.s32.totalorder %s337_s16, 1 }
  0x10   : > { %p631_p9 = por %p107_p6, %p47_p1  ;;  %p339_p12 = scmp.ge.s32.totalorder %s563_s14, 2 }
  0x11   : > { %s636_s23 = scalar_select %p38_p7, %s551_s11, %s40_s18  }
  0x12   : > { %p638_p11 = por %p113_p10, %p53_p3  ;;  %p366_p13 = scmp.lt.s32.totalorder %s563_s14, 2 }
  0x13   : > { %s133_s25 = sand.u32 1, %s551_s11   ;;  %s139_s28 = scalar_lea.hbm %s718_s0, %s559_s13 }
  0x14   : > { %s136_s29 = scalar_lea.vmem [#allocation2], %s133_s25  ;;  %s141_s3 = sshll.u32 %s139_s28, 4  ;;  %s142_s3 = int_to_ptr.hbm [resolvable:$true] %s141_s3 }
  0x15   : > { %s143_s30 = sshll.u32 %s136_s29, 4  ;;  %p651_p0 = pnand %p366_p13, %p621_p4  ;;  %s144_s30 = int_to_ptr.vmem [resolvable:$true] %s143_s30 }
  0x16   : > { %p342_p1 = scmp.ge.s32.totalorder %s563_s14, 1  ;;  %p168_p2 = scmp.lt.s32.totalorder %s563_s14, 3 }
  0x17   : > { %s134_s5 = scalar_lea.sflag [#allocation3], %s133_s25  ;;  %s340_s6 = sshll.u32 %s133_s25, 1 }
  0x18   : > { %358 = dma.hbm_to_vmem [thread:$0]  (!%p651_p0), %s142_s3, 16, %s144_s30, %s134_s5  }
  0x19   : > { %p169_p3 = pnand %p342_p1, %p168_p2  ;;  %s341_s7 = sshll.u32 %s559_s13, 1 }
  0x1a   : > { %s159_s16 = scalar_lea.hbm %s719_s1, %s341_s7  ;;  %s154_s18 = scalar_lea.vmem [#allocation5], %s340_s6 }
  0x1b   : > { %s163_s19 = sshll.u32 %s154_s18, 4  ;;  %s161_s20 = sshll.u32 %s159_s16, 4  ;;  %s164_s19 = int_to_ptr.vmem [resolvable:$true] %s163_s19  ;;  %s162_s20 = int_to_ptr.hbm [resolvable:$true] %s161_s20 }
  0x1c   : > { %s151_s26 = scalar_lea.sflag [#allocation6], %s133_s25  ;;  %172 = sbr.rel (%p169_p3) target bundleno = 52 (0x34), region = 28 }
  0x1d   : > { %361 = dma.hbm_to_vmem [thread:$0]  (!%p651_p0), %s162_s20, 32, %s164_s19, %s151_s26  }
  0x1e   : > { %s666_s27 = sand.u32 (!%p169_p3), 1, %s547_s10  }
  0x1f   : > { %s175_s28 = scalar_lea.sflag (!%p169_p3), [#allocation3], %s666_s27  ;;  %s177_s29 = scalar_lea.vmem (!%p169_p3), [#allocation2], %s666_s27 }
  0x21   : > { %530 = dma.done.wait (%p627_p8), %s175_s28, 16  }
  0x22   : > { %532 = vsyncadd (%p627_p8), %s175_s28, 4294967280  ;;  %s343_s25 = sshll.u32 %s666_s27, 1  ;;  %s184_s30 = scalar_lea.sflag [#allocation6], %s666_s27 }
  0x23   : > { %s187_s3 = scalar_lea.vmem [#allocation5], %s343_s25 }
  0x24   : > { %534 = dma.done.wait (%p627_p8), %s184_s30, 32  }
  0x25   : > { %536 = vsyncadd (%p627_p8), %s184_s30, 4294967264  ;;  %s346_s4 = sshll.u32 %s555_s12, 1  ;;  %s212_s8 = scalar_lea.vmem [#allocation7], %s343_s25  ;;  %v213_v0 = vld [vmem:[%s187_s3] sm:$0x3] }
  0x26   : > { %s232_s7 = scalar_lea.hbm %s720_s2, %s346_s4  ;;  %s234_s15 = sshll.u32 %s212_s8, 4  ;;  %v416_v1 = vld [vmem:[%s177_s29] ss:$0 sm:$0xff]  ;;  %s235_s15 = int_to_ptr.vmem [resolvable:$true] %s234_s15 }
  0x27   : > { %s236_s16 = sshll.u32 %s232_s7, 4  ;;  %v218_v2 = vmul.f32 %v416_v1, %v213_v0  ;;  %s221_s18 = scalar_lea.sflag [#allocation4], %s666_s27  ;;  %s237_s16 = int_to_ptr.hbm [resolvable:$true] %s236_s16 }
  0x28   : > { %s491_s21 = sshra.s32 %s237_s16, 4  ;;  %s497_s26 = scalar_lea.hbm %s720_s2, 4  ;;  %s492_s21 = int_to_ptr.hbm [resolvable:$true] %s491_s21 }
  0x29   : > { %219 = vst [vmem:[%s212_s8] sm:$0x3] %v218_v2  ;;  %s493_s19 = scalar_lea.hbm %s492_s21, 2  ;;  %p498_p7 = scmp.lt.s32.totalorder %s492_s21, %s720_s2 }
  0x2a   : > { %p494_p4 = scmp.ne.s32.totalorder %s492_s21, %s493_s19  ;;  %p499_p8 = scmp.lt.s32.totalorder %s497_s26, %s493_s19 }
  0x2c   : > { %p495_p5 = pnand %p494_p4, %p631_p9  ;;  %p500_p10 = por %p499_p8, %p498_p7 }
  0x2e   : > { %p496_p6 = pneg %p495_p5 }
  0x30   : > { %p501_p13 = pnand %p500_p10, %p496_p6 }
  0x32   : > { %504 = shalt.err (!%p501_p13)
}
  0x33   : > { %353 = dma.vmem_to_hbm [thread:$0]  (%p631_p9), %s235_s15, 32, %s237_s16, %s221_s18  }
  0x34 PF: > { %s248_s27 = sand.u32 1, %s543_s9   ;;  %p363_p0 = pnand %p339_p12, %p638_p11 }
  0x35   : > { %s249_s29 = scalar_lea.sflag [#allocation4], %s248_s27 }
  0x36   : > { %p364_p1 = pneg %p363_p0 }
  0x38   : > { %538 = dma.done.wait (%p364_p1), %s249_s29, 32  }
  0x39   : > { %540 = vsyncadd (%p364_p1), %s249_s29, 4294967264  ;;  %s21_s14 = sadd.s32 1, %s563_s14   ;;  %s726_s9 = smov %s547_s10 }
  0x3a   : > { %p18_p2 = scmp.ge.s32.totalorder %s21_s14, 4   ;;  %s727_s10 = smov %s551_s11 }
  0x3b   : > { %s728_s11 = smov %s636_s23  ;;  %s729_s12 = smov %s559_s13 }
  0x3c   : > { %s730_s13 = smov %s732_s17  ;;  %20 = sbr.rel (!%p18_p2) target bundleno = 8 (0x8), region = 86 }
  0x41   :  { %255 = vsyncpa [#allocation3], 1 }
  0x42   :  { %257 = vsyncpa [#allocation3 + $0x1], 1 }
  0x43   :  { %258 = vsyncpa [#allocation6], 1 }
  0x44   :  { %260 = vsyncpa [#allocation6 + $0x1], 1 }
  0x45   :  { %261 = vsyncpa [#allocation4], 1 }
  0x46   :  { %263 = vsyncpa [#allocation4 + $0x1], 1 }

</bundles_post_ra>
